<compile_context>
chip_gen: v6e
topology: v6e:2x2x1
jax: 0.10.0
libtpu: 0.0.40
codegen_flags: <defaults>
</compile_context>

<pallas_src>
import jax
import jax.numpy as jnp
from jax.experimental import pallas as pl
from jax.experimental.pallas import tpu as pltpu


def _cdiv(a, b):
    return -(-a // b)


def _make_pou_kernel(d):
    def kernel(x_ref, s_ref, o_ref):
        x = x_ref[...]                                    # (tm, 128*d), native dtype
        # Range test in the input's native dtype (no wrapper-side cast / HBM pass).
        flag = jnp.logical_and(x >= -1.0, x < 1.0)        # bool, lane-dense
        flag = flag.astype(jnp.bfloat16)                  # 0/1, exact in bf16
        # Grouped AND-reduce via MXU: sum of the D flags per point, f32 accumulate.
        sums = jnp.dot(flag, s_ref[...],
                       preferred_element_type=jnp.float32)     # (tm, 128)
        o_ref[...] = (sums >= (d - 0.5)).astype(o_ref.dtype)   # 1.0 iff all D in range
    return kernel


def pou(x, keepdim: bool = False, tm_cap: int = 1024, tile_bytes: int = 4 << 20):
    orig_shape = x.shape
    D = int(orig_shape[-1])
    N = 1
    for s in orig_shape[:-1]:
        N *= int(s)

    P = 128                    # points packed per lane-row
    W = P * D                  # packed-row lane width (always a multiple of 128)
    Np = N // P                # full packed rows (aligned prefix)
    N_main = Np * P
    tail = N - N_main          # < 128 leftover points, handled with plain jnp

    x2 = x.reshape(N, D)       # free view

    pieces = []
    if Np > 0:
        xp = (x2[:N_main] if tail else x2).reshape(Np, W)   # contiguous packed view

        itemsize = x2.dtype.itemsize
        # Sublane multiple for the input dtype (8 for 4B, 16 for 2B, 32 for 1B).
        sublane = max(8, 32 // itemsize)

        # ---- Tile sizing: byte budget first, then ensure >= 4 grid steps when
        # there is enough work (>= 2 steps per v7x TensorCore for pipelining).
        tm = max(1, tile_bytes // (W * itemsize))
        tm = min(tm, tm_cap, Np)
        if Np >= 4 * 64:                       # enough work: split, but keep tiles >= 64 rows
            tm = min(tm, _cdiv(Np, 4))
        if tm < Np:                            # partial tiling -> round to sublane multiple
            tm = max(sublane, (tm // sublane) * sublane)
            tm = min(tm, Np)
        grid = _cdiv(Np, tm)

        # Group-selection matrix: sel[i, j] = 1 iff lane i belongs to point j.
        sel = (jnp.arange(W, dtype=jnp.int32)[:, None] // D
               == jnp.arange(P, dtype=jnp.int32)[None, :]).astype(jnp.bfloat16)

        out = pl.pallas_call(
            _make_pou_kernel(D),
            out_shape=jax.ShapeDtypeStruct((Np, P), jnp.float32),
            grid_spec=pl.GridSpec(
                grid=(grid,),
                in_specs=[
                    pl.BlockSpec((tm, W), lambda i: (i, 0)),   # packed points
                    pl.BlockSpec((W, P), lambda i: (0, 0)),    # selection matrix (constant block)
                ],
                out_specs=pl.BlockSpec((tm, P), lambda i: (i, 0)),
            ),
            compiler_params=pltpu.CompilerParams(
                # Single row-tile axis; "parallel" lets megacore shard it across TCs.
                dimension_semantics=("parallel",),
                # Safe on all generations (v5e/v6e physical 128 MiB, v7x 64 MiB);
                # raises v5e's 16 MiB default so the 4 MiB double-buffered tiles fit.
                vmem_limit_bytes=32 * 1024 * 1024,
            ),
        )(xp, sel)
        pieces.append(out.reshape(N_main))     # free reshape, no slice copy

    if tail > 0:
        xt = x2[N_main:]                       # tiny (< 128 points)
        tflag = jnp.all(jnp.logical_and(xt >= -1.0, xt < 1.0), axis=-1)
        pieces.append(tflag.astype(jnp.float32))

    flat = pieces[0] if len(pieces) == 1 else jnp.concatenate(pieces)

    if keepdim:
        return flat.reshape(orig_shape[:-1] + (1,))
    return flat.reshape(orig_shape[:-1])


def _pou_ref(x, keepdim: bool = False):
    flag = jnp.logical_and(x >= -1.0, x < 1.0)
    return jnp.prod(flag.astype(jnp.float32), axis=-1, keepdims=keepdim)


if __name__ == "__main__":
    key = jax.random.PRNGKey(0)
    k1, k2, k3, k4 = jax.random.split(key, 4)

    # Aligned N (= 256 points), D = 8.
    x1 = jax.random.uniform(k1, (2, 128, 8), dtype=jnp.float32, minval=-2.0, maxval=2.0)
    # Unaligned N (= 150): 128-aligned prefix through the kernel + jnp tail.
    x2 = jax.random.uniform(k2, (3, 50, 8), dtype=jnp.float32, minval=-2.0, maxval=2.0)
    # Larger unaligned N: multi-row packed view + tail.
    x3 = jax.random.uniform(k3, (5000, 8), dtype=jnp.float32, minval=-2.0, maxval=2.0)
    # Fewer than 128 points: pure tail path (no pallas_call).
    x4 = jax.random.uniform(k4, (5, 8), dtype=jnp.float32, minval=-2.0, maxval=2.0)

    for xi, kd in ((x1, False), (x1, True), (x2, False), (x3, False), (x4, True)):
        out = pou(xi, keepdim=kd)
        jax.block_until_ready(out)
        ref = _pou_ref(xi, keepdim=kd)
        assert out.shape == ref.shape, (out.shape, ref.shape)
        assert jnp.array_equal(out, ref), "kernel/reference mismatch"

    print("KERNEL_OK")
</pallas_src>

<mosaic_0001>
module attributes {stable_mosaic.version = 11 : i64} {
  func.func @kernel(%arg0: i32, %arg1: memref<2x1024xf32, #tpu.memory_space<vmem>>, %arg2: memref<1024x128xbf16, #tpu.memory_space<vmem>>, %arg3: memref<2x128xf32, #tpu.memory_space<vmem>>) attributes {dimension_semantics = [#tpu.dimension_semantics<parallel>], iteration_bounds = array<i64: 1>, scalar_prefetch = 0 : i64, scratch_operands = 0 : i64, tpu.core_type = #tpu.core_type<tc>, window_params = [{transform_indices = @transform_0, window_bounds = array<i64: 2, 1024>}, {pipeline_mode = #tpu.pipeline_mode<synchronous>, transform_indices = @transform_1, window_bounds = array<i64: 1024, 128>}, {transform_indices = @transform_2, window_bounds = array<i64: 2, 128>}]} {
    %c0 = arith.constant 0 : index
    %c0_0 = arith.constant 0 : index
    %0 = vector.load %arg1[%c0, %c0_0] : memref<2x1024xf32, #tpu.memory_space<vmem>>, vector<2x1024xf32>
    %cst = arith.constant -1.000000e+00 : f32
    %1 = vector.broadcast %cst : f32 to vector<2x1024xf32>
    %2 = arith.cmpf oge, %0, %1 : vector<2x1024xf32>
    %cst_1 = arith.constant 1.000000e+00 : f32
    %3 = vector.broadcast %cst_1 : f32 to vector<2x1024xf32>
    %4 = arith.cmpf olt, %0, %3 : vector<2x1024xf32>
    %5 = arith.andi %2, %4 : vector<2x1024xi1>
    %6 = arith.extui %5 : vector<2x1024xi1> to vector<2x1024xi32>
    %7 = arith.sitofp %6 : vector<2x1024xi32> to vector<2x1024xf32>
    %8 = arith.truncf %7 : vector<2x1024xf32> to vector<2x1024xbf16>
    %c0_2 = arith.constant 0 : index
    %c0_3 = arith.constant 0 : index
    %9 = vector.load %arg2[%c0_2, %c0_3] : memref<1024x128xbf16, #tpu.memory_space<vmem>>, vector<1024x128xbf16>
    %cst_4 = arith.constant dense<0.000000e+00> : vector<2x128xf32>
    %10 = tpu.matmul %8, %9, %cst_4 {dimension_numbers = #tpu.dot_dimension_numbers<[1], [0], [0], [1], [0, 0, 1, 1], [], []>} : vector<2x1024xbf16>, vector<1024x128xbf16>, vector<2x128xf32> -> vector<2x128xf32>
    %cst_5 = arith.constant 7.500000e+00 : f32
    %11 = vector.broadcast %cst_5 : f32 to vector<2x128xf32>
    %12 = arith.cmpf oge, %10, %11 : vector<2x128xf32>
    %13 = arith.extui %12 : vector<2x128xi1> to vector<2x128xi32>
    %14 = arith.sitofp %13 : vector<2x128xi32> to vector<2x128xf32>
    %c0_6 = arith.constant 0 : index
    %c0_7 = arith.constant 0 : index
    %15 = vector.load %arg3[%c0_6, %c0_7] : memref<2x128xf32, #tpu.memory_space<vmem>>, vector<2x128xf32>
    tpu.vector_store %arg3[%c0_6, %c0_7], %14 {strides = array<i32>} : memref<2x128xf32, #tpu.memory_space<vmem>>, vector<2x128xf32>,
    return
  }
  func.func @transform_0(%arg0: i32) -> (i32, i32) {
    %c0_i32 = arith.constant 0 : i32
    %c0_i32_0 = arith.constant 0 : i32
    return %arg0, %c0_i32 : i32, i32
  }
  func.func @transform_1(%arg0: i32) -> (i32, i32) {
    %c0_i32 = arith.constant 0 : i32
    %c0_i32_0 = arith.constant 0 : i32
    %c0_i32_1 = arith.constant 0 : i32
    return %c0_i32, %c0_i32_0 : i32, i32
  }
  func.func @transform_2(%arg0: i32) -> (i32, i32) {
    %c0_i32 = arith.constant 0 : i32
    %c0_i32_0 = arith.constant 0 : i32
    return %arg0, %c0_i32 : i32, i32
  }
}

</mosaic_0001>

<bundles_post_ra>
// kernel: tpu_custom_call.1
= control target key start
LH: loop header
LB: loop body
LE: loop exit
PB: predicated region body
PF: predicated region fallthrough
CT: control target
= control target key end

     0   :  { %7 = vsyncpa [#allocation3], 0  ;;  %s1127_s0 = inlined_call_operand.hbm [shape: f32[2,1024], index: 0, kind: input, shape index: {}]   ;;  %s1128_s1 = inlined_call_operand.hbm [shape: bf16[1024,128], index: 1, kind: input, shape index: {}]   ;;  %s1129_s2 = inlined_call_operand.hbm [shape: f32[2,128], index: 2, kind: output, shape index: {}]  }
   0x1   :  { %8 = vsyncpa [#allocation6], 0 }
   0x2   :  { %9 = vsyncpa [#allocation4], 0  ;;  %s1087_s9 = smov [#allocation2]   ;;  %s1088_s11 = smov [#allocation5]  }
   0x3   :  { %s16_s10 = sshll.u32 %s1087_s9, 4  ;;  %s25_s12 = sshll.u32 %s1088_s11, 4  ;;  %s17_s10 = int_to_ptr.vmem [resolvable:$true] %s16_s10  ;;  %s26_s12 = int_to_ptr.vmem [resolvable:$true] %s25_s12 }
   0x4   :  { %s1029_s13 = scalar_lea.vmem %s17_s10, 256  ;;  %p1034_p1 = scmp.lt.s32.totalorder %s17_s10, %s17_s10 }
   0x5   :  { %p1030_p0 = scmp.ne.s32.totalorder %s17_s10, %s1029_s13  ;;  %p1035_p2 = scmp.lt.s32.totalorder %s1029_s13, %s1029_s13 }
   0x7   :  { %p1036_p3 = por %p1035_p2, %p1034_p1 }
   0x9   :  { %p1037_p4 = pnand %p1036_p3, %p1030_p0 }
   0xb   :  { %1040 = shalt.err (!%p1037_p4)
}
   0xc   :  { %19 = dma.hbm_to_vmem [thread:$0]  %s1127_s0, 256, %s17_s10, [#allocation3]  }
   0xd   :  { %s1049_s16 = scalar_lea.vmem %s26_s12, 8192  ;;  %p1054_p6 = scmp.lt.s32.totalorder %s26_s12, %s26_s12 }
   0xe   :  { %p1050_p5 = scmp.ne.s32.totalorder %s26_s12, %s1049_s16  ;;  %p1055_p7 = scmp.lt.s32.totalorder %s1049_s16, %s1049_s16 }
  0x10   :  { %p1056_p8 = por %p1055_p7, %p1054_p6 }
  0x12   :  { %p1057_p9 = pnand %p1056_p8, %p1050_p5 }
  0x14   :  { %1060 = shalt.err (!%p1057_p9)
}
  0x15   :  { %s1089_s17 = smov 64   ;;  %s1090_s18 = smov 4  }
  0x16   :  { %31 = dma.hbm_to_vmem [thread:$0]  %s1128_s1, 8192, %s26_s12, [#allocation6], %s1089_s17, %s1089_s17, %s1090_s18  }
  0x17   :  { %1081 = dma.done.wait [#allocation3], 256  }
  0x18   :  { %1082 = vsyncadd [#allocation3], 4294967040 }
  0x19   :  { %1083 = dma.done.wait [#allocation6], 8192  }
  0x1a   :  { %1084 = vsyncadd [#allocation6], 4294959104  ;;  %v957_v0 = vld [vmem:[#allocation5 + $0x78] sm:$0xff]   ;;  %v961_v4 = vld [vmem:[#allocation5 + $0x70] sm:$0xff]   ;;  %v1091_v25 = vmov 1983009808   ;;  %v57_v27 = vlaneseq }
  0x1b   :  { %v958_v1 = vld [vmem:[#allocation5 + $0xf8] sm:$0xff]   ;;  %862 = vmatprep.subr.bf16.mxu0 %v957_v0  ;;  %v962_v5 = vld [vmem:[#allocation5 + $0xf0] sm:$0xff]   ;;  %v965_v8 = vld [vmem:[#allocation5 + $0x68] sm:$0xff]   ;;  %v55_v26 = vunpack.c.l.s4 %v1091_v25  ;;  %v1092_v41 = vmov 0.0   ;;  %s1093_s0 = smov [#allocation7]  }
  0x1c   :  { %v959_v2 = vld [vmem:[#allocation5 + $0x38] sm:$0xff]   ;;  %884 = vmatprep.subr.bf16.mxu1 %v958_v1  ;;  %v963_v6 = vld [vmem:[#allocation5 + $0x30] sm:$0xff]   ;;  %v966_v9 = vld [vmem:[#allocation5 + $0xe8] sm:$0xff]   ;;  %v58_v33 = vshrl.u32 %v57_v27, 7  ;;  %s785_s1 = sshll.u32 %s1093_s0, 4  ;;  %s786_s1 = int_to_ptr.vmem [resolvable:$true] %s785_s1 }
  0x1d   :  { %v960_v3 = vld [vmem:[#allocation5 + $0xb8] sm:$0xff]   ;;  %863 = vmatpush3.bf16.msra.mxu0 %v959_v2  ;;  %v964_v7 = vld [vmem:[#allocation5 + $0xb0] sm:$0xff]   ;;  %v967_v10 = vld [vmem:[#allocation5 + $0x28] sm:$0xff]   ;;  %v56_v32 = vunpack.c.0.s8 %v55_v26  ;;  %s1061_s21 = scalar_lea.vmem %s786_s1, 32  ;;  %p1066_p11 = scmp.lt.s32.totalorder %s786_s1, %s786_s1 }
  0x1e   :  { %885 = vmatpush3.bf16.msra.mxu1 %v960_v3  ;;  %864 = vmatprep.subr.bf16.mxu0 %v961_v4  ;;  %v968_v11 = vld [vmem:[#allocation5 + $0xa8] sm:$0xff]   ;;  %v969_v12 = vld [vmem:[#allocation5 + $0x60] sm:$0xff]   ;;  %v973_v16 = vld [vmem:[#allocation5 + $0x58] sm:$0xff]   ;;  %p1062_p10 = scmp.ne.s32.totalorder %s786_s1, %s1061_s21  ;;  %p1067_p12 = scmp.lt.s32.totalorder %s1061_s21, %s1061_s21 }
  0x1f   :  { %886 = vmatprep.subr.bf16.mxu1 %v962_v5  ;;  %v970_v13 = vld [vmem:[#allocation5 + $0xe0] sm:$0xff]   ;;  %v974_v17 = vld [vmem:[#allocation5 + $0xd8] sm:$0xff]   ;;  %v977_v20 = vld [vmem:[#allocation5 + $0x50] sm:$0xff]   ;;  %v1115_v38 = vsub.s32 %v56_v32, %v58_v33 }
  0x20   :  { %v971_v14 = vld [vmem:[#allocation5 + $0x20] sm:$0xff]   ;;  %v975_v18 = vld [vmem:[#allocation5 + $0x18] sm:$0xff]   ;;  %v978_v21 = vld [vmem:[#allocation5 + $0xd0] sm:$0xff]   ;;  %p1068_p13 = por %p1067_p12, %p1066_p11 }
  0x21   :  { %865 = vmatpush3.bf16.msra.mxu0 %v963_v6  ;;  %v972_v15 = vld [vmem:[#allocation5 + $0xa0] sm:$0xff]   ;;  %v976_v19 = vld [vmem:[#allocation5 + $0x98] sm:$0xff]   ;;  %v979_v22 = vld [vmem:[#allocation5 + $0x10] sm:$0xff]  }
  0x22   :  { %887 = vmatpush3.bf16.msra.mxu1 %v964_v7  ;;  %866 = vmatprep.subr.bf16.mxu0 %v965_v8  ;;  %v980_v23 = vld [vmem:[#allocation5 + $0x90] sm:$0xff]   ;;  %v981_v24 = vld [vmem:[#allocation5 + $0x48] sm:$0xff]   ;;  %v985_v31 = vld [vmem:[#allocation5 + $0x40] sm:$0xff]   ;;  %p1069_p0 = pnand %p1068_p13, %p1062_p10 }
  0x23   :  { %888 = vmatprep.subr.bf16.mxu1 %v966_v9  ;;  %v982_v28 = vld [vmem:[#allocation5 + $0xc8] sm:$0xff]   ;;  %v986_v34 = vld [vmem:[#allocation5 + $0xc0] sm:$0xff]   ;;  %v39_v37 = vld [vmem:[#allocation2] sm:$0xff] }
  0x24   :  { %v983_v29 = vld [vmem:[#allocation5 + $0x8] sm:$0xff]   ;;  %v987_v35 = vld [vmem:[#allocation5] sm:$0xff]   ;;  %vm41_vm0 = vcmp.ge.f32.partialorder %v39_v37, -1.0  ;;  %vm43_vm1 = vcmp.lt.f32.partialorder %v39_v37, 1.0  ;;  %v989_v39 = vld [vmem:[#allocation5 + $0x178] sm:$0xff]  }
  0x25   :  { %867 = vmatpush3.bf16.msra.mxu0 %v967_v10  ;;  %v984_v30 = vld [vmem:[#allocation5 + $0x88] sm:$0xff]   ;;  %v988_v36 = vld [vmem:[#allocation5 + $0x80] sm:$0xff]   ;;  %v990_v40 = vld [vmem:[#allocation5 + $0x1f8] sm:$0xff]  }
  0x26   :  { %889 = vmatpush3.bf16.msra.mxu1 %v968_v11  ;;  %868 = vmatprep.subr.bf16.mxu0 %v969_v12  ;;  %vm45_vm2 = vmand %vm41_vm0, %vm43_vm1  ;;  %v991_v50 = vld [vmem:[#allocation5 + $0x138] sm:$0xff]   ;;  %v993_v52 = vld [vmem:[#allocation5 + $0x170] sm:$0xff]  }
  0x27   :  { %890 = vmatprep.subr.bf16.mxu1 %v970_v13  ;;  %v795_v42 = vsel %vm45_vm2, 1.0, %v1092_v41  ;;  %v992_v54 = vld [vmem:[#allocation5 + $0x1b8] sm:$0xff]   ;;  %v994_v55 = vld [vmem:[#allocation5 + $0x1f0] sm:$0xff]   ;;  %v997_v57 = vld [vmem:[#allocation5 + $0x168] sm:$0xff]  }
  0x28   :  { %v60_v43 = vrot.slane %v795_v42, %v1115_v38  ;;  %v53_v44 = vcombine.high %v795_v42, %v795_v42  ;;  %v995_v56 = vld [vmem:[#allocation5 + $0x130] sm:$0xff]   ;;  %v998_v59 = vld [vmem:[#allocation5 + $0x1e8] sm:$0xff]   ;;  %v1001_v61 = vld [vmem:[#allocation5 + $0x160] sm:$0xff]  }
  0x29   :  { %869 = vmatpush3.bf16.msra.mxu0 %v971_v14  ;;  %v996_v58 = vld [vmem:[#allocation5 + $0x1b0] sm:$0xff]   ;;  %v999_v60 = vld [vmem:[#allocation5 + $0x128] sm:$0xff]   ;;  %v1002_v63 = vld [vmem:[#allocation5 + $0x1e0] sm:$0xff]  }
  0x2a   :  { %891 = vmatpush3.bf16.msra.mxu1 %v972_v15  ;;  %870 = vmatprep.subr.bf16.mxu0 %v973_v16  ;;  %v68_v45 = vcombine.high %v60_v43, %v60_v43  ;;  %v67_v46 = vrot.slane %v53_v44, %v1115_v38  ;;  %v95_v47 = vpack.c.bf16 %v60_v43, %v60_v43  ;;  %v1000_v62 = vld [vmem:[#allocation5 + $0x1a8] sm:$0xff]   ;;  %v1003_v0 = vld [vmem:[#allocation5 + $0x120] sm:$0xff]   ;;  %v1005_v1 = vld [vmem:[#allocation5 + $0x158] sm:$0xff]  }
  0x2b   :  { %892 = vmatprep.subr.bf16.mxu1 %v974_v17  ;;  %v1004_v2 = vld [vmem:[#allocation5 + $0x1a0] sm:$0xff]   ;;  %v1006_v3 = vld [vmem:[#allocation5 + $0x1d8] sm:$0xff]   ;;  %v1009_v5 = vld [vmem:[#allocation5 + $0x150] sm:$0xff]  }
  0x2c   :  { %v96_v48 = vpack.c.bf16 %v68_v45, %v68_v45  ;;  %v69_v49 = vcombine.high %v67_v46, %v67_v46  ;;  %v97_v51 = vpack.c.bf16 %v67_v46, %v67_v46  ;;  %v1007_v4 = vld [vmem:[#allocation5 + $0x118] sm:$0xff]   ;;  %v1010_v7 = vld [vmem:[#allocation5 + $0x1d0] sm:$0xff]   ;;  %v1013_v9 = vld [vmem:[#allocation5 + $0x148] sm:$0xff]  }
  0x2d   :  { %871 = vmatpush3.bf16.msra.mxu0 %v975_v18  ;;  %v1008_v6 = vld [vmem:[#allocation5 + $0x198] sm:$0xff]   ;;  %v1011_v8 = vld [vmem:[#allocation5 + $0x110] sm:$0xff]   ;;  %v1014_v11 = vld [vmem:[#allocation5 + $0x1c8] sm:$0xff]  }
  0x2e   :  { %893 = vmatpush3.bf16.msra.mxu1 %v976_v19  ;;  %872 = vmatprep.subr.bf16.mxu0 %v977_v20  ;;  %v98_v53 = vpack.c.bf16 %v69_v49, %v69_v49  ;;  %v1012_v10 = vld [vmem:[#allocation5 + $0x190] sm:$0xff]   ;;  %v1015_v12 = vld [vmem:[#allocation5 + $0x108] sm:$0xff]   ;;  %v40_v13 = vld [vmem:[#allocation2 + $0x8] sm:$0xff] }
  0x2f   :  { %894 = vmatprep.subr.bf16.mxu1 %v978_v21  ;;  %647 = vmatprep.mubr.bf16.mxu0 %v96_v48  ;;  %v1017_v14 = vld [vmem:[#allocation5 + $0x140] sm:$0xff]   ;;  %vm42_vm3 = vcmp.ge.f32.partialorder %v40_v13, -1.0  ;;  %vm44_vm4 = vcmp.lt.f32.partialorder %v40_v13, 1.0  ;;  %v1016_v15 = vld [vmem:[#allocation5 + $0x188] sm:$0xff]  }
  0x30   :  { %687 = vmatprep.mubr.bf16.mxu1 %v98_v53  ;;  %vm46_vm5 = vmand %vm42_vm3, %vm44_vm4  ;;  %v1018_v16 = vld [vmem:[#allocation5 + $0x1c0] sm:$0xff]  }
  0x31   :  { %873 = vmatpush3.bf16.msra.mxu0 %v979_v22  ;;  %v796_v17 = vsel %vm46_vm5, 1.0, %v1092_v41  ;;  %v1019_v18 = vld [vmem:[#allocation5 + $0x100] sm:$0xff]  }
  0x32   :  { %895 = vmatpush3.bf16.msra.mxu1 %v980_v23  ;;  %874 = vmatprep.subr.bf16.mxu0 %v981_v24  ;;  %v77_v19 = vrot.slane %v796_v17, %v1115_v38  ;;  %v70_v20 = vcombine.high %v796_v17, %v796_v17  ;;  %v1020_v21 = vld [vmem:[#allocation5 + $0x180] sm:$0xff]  }
  0x33   :  { %896 = vmatprep.subr.bf16.mxu1 %v982_v28 }
  0x34   :  { %v85_v22 = vcombine.high %v77_v19, %v77_v19  ;;  %v84_v23 = vrot.slane %v70_v20, %v1115_v38  ;;  %v99_v24 = vpack.c.bf16 %v77_v19, %v77_v19 }
  0x35   :  { %875 = vmatpush3.bf16.msra.mxu0 %v983_v29 }
  0x36   :  { %897 = vmatpush3.bf16.msra.mxu1 %v984_v30  ;;  %876 = vmatprep.subr.bf16.mxu0 %v985_v31  ;;  %v100_v25 = vpack.c.bf16 %v85_v22, %v85_v22  ;;  %v86_v26 = vcombine.high %v84_v23, %v84_v23  ;;  %v101_v27 = vpack.c.bf16 %v84_v23, %v84_v23 }
  0x37   :  { %898 = vmatprep.subr.bf16.mxu1 %v986_v34 }
  0x38   :  { %v102_v28 = vpack.c.bf16 %v86_v26, %v86_v26 }
  0x39   :  { %877 = vmatpush3.bf16.msra.mxu0 %v987_v35 }
  0x3a   :  { %899 = vmatpush3.bf16.msra.mxu1 %v988_v36  ;;  %906 = vmatprep.subr.bf16.mxu0 %v989_v39 }
  0x3b   :  { %928 = vmatprep.subr.bf16.mxu1 %v990_v40 }
  0x3c   :  { %648 = vmatmul.mubr.bf16.vlgmr.msra.gmra.mxu0 %v95_v47 }
  0x3d   :  { %907 = vmatpush3.bf16.msra.mxu0 %v991_v50  ;;  %688 = vmatmul.mubr.bf16.vlgmr.msra.gmra.mxu1 %v97_v51 }
  0x3e   :  { %908 = vmatprep.subr.bf16.mxu0 %v993_v52  ;;  %929 = vmatpush3.bf16.msra.mxu1 %v992_v54 }
  0x3f   :  { %930 = vmatprep.subr.bf16.mxu1 %v994_v55  ;;  %727 = vmatprep.mubr.bf16.mxu0 %v100_v25 }
  0x40   :  { %767 = vmatprep.mubr.bf16.mxu1 %v102_v28 }
  0x41   :  { %909 = vmatpush3.bf16.msra.mxu0 %v995_v56 }
  0x42   :  { %910 = vmatprep.subr.bf16.mxu0 %v997_v57  ;;  %931 = vmatpush3.bf16.msra.mxu1 %v996_v58 }
  0x43   :  { %932 = vmatprep.subr.bf16.mxu1 %v998_v59 }
  0x45   :  { %911 = vmatpush3.bf16.msra.mxu0 %v999_v60 }
  0x46   :  { %912 = vmatprep.subr.bf16.mxu0 %v1001_v61  ;;  %933 = vmatpush3.bf16.msra.mxu1 %v1000_v62 }
  0x47   :  { %934 = vmatprep.subr.bf16.mxu1 %v1002_v63 }
  0x49   :  { %913 = vmatpush3.bf16.msra.mxu0 %v1003_v0 }
  0x4a   :  { %914 = vmatprep.subr.bf16.mxu0 %v1005_v1  ;;  %935 = vmatpush3.bf16.msra.mxu1 %v1004_v2 }
  0x4b   :  { %936 = vmatprep.subr.bf16.mxu1 %v1006_v3 }
  0x4d   :  { %915 = vmatpush3.bf16.msra.mxu0 %v1007_v4 }
  0x4e   :  { %916 = vmatprep.subr.bf16.mxu0 %v1009_v5  ;;  %937 = vmatpush3.bf16.msra.mxu1 %v1008_v6 }
  0x4f   :  { %938 = vmatprep.subr.bf16.mxu1 %v1010_v7 }
  0x51   :  { %917 = vmatpush3.bf16.msra.mxu0 %v1011_v8 }
  0x52   :  { %918 = vmatprep.subr.bf16.mxu0 %v1013_v9  ;;  %939 = vmatpush3.bf16.msra.mxu1 %v1012_v10 }
  0x53   :  { %940 = vmatprep.subr.bf16.mxu1 %v1014_v11 }
  0x55   :  { %919 = vmatpush3.bf16.msra.mxu0 %v1015_v12 }
  0x56   :  { %920 = vmatprep.subr.bf16.mxu0 %v1017_v14  ;;  %941 = vmatpush3.bf16.msra.mxu1 %v1016_v15 }
  0x57   :  { %942 = vmatprep.subr.bf16.mxu1 %v1018_v16 }
  0x59   :  { %921 = vmatpush3.bf16.msra.mxu0 %v1019_v18 }
  0x5a   :  { %943 = vmatpush3.bf16.msra.mxu1 %v1020_v21 }
  0x5c   :  { %728 = vmatmul.mubr.bf16.vlgmr.msra.gmra.mxu0 %v99_v24 }
  0x5d   :  { %768 = vmatmul.mubr.bf16.vlgmr.msra.gmra.mxu1 %v101_v27 }
  0xfc   :  { %v878_v29 = vpop.f32.mrf.mxu0 }
  0xfd   :  { %v900_v30 = vpop.f32.mrf.mxu1 }
  0xfe   :  { %v879_v31 = vpop.f32.mrf.mxu0 }
  0xff   :  { %v901_v32 = vpop.f32.mrf.mxu1  ;;  %v880_v37 = vadd.f32 %v879_v31, %v878_v29 }
 0x100   :  { %v881_v33 = vpop.f32.mrf.mxu0  ;;  %v902_v38 = vadd.f32 %v901_v32, %v900_v30 }
 0x101   :  { %v903_v34 = vpop.f32.mrf.mxu1 }
 0x102   :  { %v882_v35 = vpop.f32.mrf.mxu0  ;;  %v690_v43 = vadd.f32 %v902_v38, %v880_v37 }
 0x103   :  { %v904_v36 = vpop.f32.mrf.mxu1 }
 0x11c   :  { %v922_v39 = vpop.f32.mrf.mxu0 }
 0x11d   :  { %v944_v40 = vpop.f32.mrf.mxu1 }
 0x11e   :  { %v923_v42 = vpop.f32.mrf.mxu0 }
 0x11f   :  { %v924_v44 = vadd.f32 %v923_v42, %v922_v39  ;;  %v945_v45 = vpop.f32.mrf.mxu1 }
 0x120   :  { %v925_v46 = vpop.f32.mrf.mxu0  ;;  %v946_v48 = vadd.f32 %v945_v45, %v944_v40 }
 0x121   :  { %v730_v47 = vadd.f32 %v924_v44, %v690_v43  ;;  %v947_v49 = vpop.f32.mrf.mxu1 }
 0x122   :  { %v926_v50 = vpop.f32.mrf.mxu0 }
 0x123   :  { %v770_v51 = vadd.f32 %v946_v48, %v730_v47  ;;  %v948_v52 = vpop.f32.mrf.mxu1 }
 0x125   :  { %vm775_vm6 = vcmp.ge.f32.partialorder %v770_v51, 7.5 }
 0x126   :  { %v861_v53 = vsel %vm775_vm6, 1.0, %v1092_v41 }
 0x127   :  { %778 = vst [vmem:[#allocation7] sm:$0x3] %v861_v53 }
 0x128   :  { %1072 = shalt.err (!%p1069_p0)
}
 0x129   :  { %788 = dma.vmem_to_hbm [thread:$0]  %s786_s1, 32, %s1129_s2, [#allocation4]  }
 0x12a   :  { %1085 = dma.done.wait [#allocation4], 32  }
 0x12b   :  { %1086 = vsyncadd [#allocation4], 4294967264 }
 0x12c   :  { %792 = vsyncpa [#allocation3], 1 }
 0x12d   :  { %793 = vsyncpa [#allocation6], 1 }
 0x12e   :  { %794 = vsyncpa [#allocation4], 1 }

</bundles_post_ra>
